<compile_context>
chip_gen: v7x
topology: tpu7x:2x2x1
jax: 0.10.0
libtpu: 0.0.40
codegen_flags: <defaults>
</compile_context>

<pallas_src>
import jax
import jax.numpy as jnp
import numpy as np
from jax.experimental import pallas as pl
from jax.experimental.pallas import tpu as pltpu


# ----------------------------------------------------------------------------
# Pallas kernel: fused fc1 -> ReLU -> fc2 for one row-tile.
# ----------------------------------------------------------------------------
def _ffn_kernel(x_ref, w1_ref, b1_ref, w2_ref, b2_ref, o_ref):
    # x:  (tm, hid)
    # w1: (pf, hid)   (PyTorch Linear layout, contracted on its dim 1)
    # b1: (1, pf)
    # w2: (hid, pf)
    # b2: (1, hid)
    x = x_ref[...]

    # fc1: x @ w1.T  -- contract last dim of x with last dim of w1 (no
    # host-side transpose; the MXU handles the transposed operand).
    h = jax.lax.dot_general(
        x, w1_ref[...],
        dimension_numbers=(((1,), (1,)), ((), ())),
        preferred_element_type=jnp.float32,
    )
    h = jnp.maximum(h + b1_ref[...], 0.0)  # ReLU (dropout = identity in eval)

    # fc2: h @ w2.T
    y = jax.lax.dot_general(
        h, w2_ref[...],
        dimension_numbers=(((1,), (1,)), ((), ())),
        preferred_element_type=jnp.float32,
    )
    o_ref[...] = (y + b2_ref[...]).astype(o_ref.dtype)


# ----------------------------------------------------------------------------
# Wrapper
# ----------------------------------------------------------------------------
def _round_up(x, m):
    return (x + m - 1) // m * m


def positionwise_feedforward(x, params, *, block_m=256):
    """x: (..., hid_dim). Returns fc2(relu(fc1(x))) with eval-mode dropout."""
    orig_shape = x.shape
    hid = orig_shape[-1]
    pf = params["w1"].shape[0]

    x2d = x.reshape(-1, hid)
    M = x2d.shape[0]

    # Row tile: multiple of 8 sublanes; pad rows so the grid divides evenly.
    tm = min(block_m, _round_up(M, 8))
    Mp = _round_up(M, tm)
    if Mp != M:
        x2d = jnp.pad(x2d, ((0, Mp - M), (0, 0)))

    out = pl.pallas_call(
        _ffn_kernel,
        out_shape=jax.ShapeDtypeStruct((Mp, hid), x.dtype),
        grid=(Mp // tm,),
        in_specs=[
            pl.BlockSpec((tm, hid), lambda i: (i, 0)),   # activations (tiled rows)
            pl.BlockSpec((pf, hid), lambda i: (0, 0)),   # w1 (whole, VMEM-resident)
            pl.BlockSpec((1, pf), lambda i: (0, 0)),     # b1
            pl.BlockSpec((hid, pf), lambda i: (0, 0)),   # w2
            pl.BlockSpec((1, hid), lambda i: (0, 0)),    # b2
        ],
        out_specs=pl.BlockSpec((tm, hid), lambda i: (i, 0)),
        compiler_params=pltpu.CompilerParams(
            dimension_semantics=("parallel",),
        ),
    )(
        x2d,
        params["w1"],
        params["b1"].reshape(1, pf),
        params["w2"],
        params["b2"].reshape(1, hid),
    )

    if Mp != M:
        out = out[:M]
    return out.reshape(orig_shape)


# ----------------------------------------------------------------------------
# Pure-JAX reference (eval-mode PyTorch semantics)
# ----------------------------------------------------------------------------
def ref_forward(x, p):
    h = jnp.maximum(x @ p["w1"].T + p["b1"], 0.0)
    return h @ p["w2"].T + p["b2"]


# ----------------------------------------------------------------------------
# Main
# ----------------------------------------------------------------------------
if __name__ == "__main__":
    B, L, hid, pf = 2, 8, 32, 64

    key0 = jax.random.PRNGKey(0)
    keys = jax.random.split(key0, 5)

    # PyTorch Linear layout: weight = (out_features, in_features).
    params = {
        "w1": 0.1 * jax.random.normal(keys[0], (pf, hid), jnp.float32),
        "b1": 0.1 * jax.random.normal(keys[1], (pf,), jnp.float32),
        "w2": 0.1 * jax.random.normal(keys[2], (hid, pf), jnp.float32),
        "b2": 0.1 * jax.random.normal(keys[3], (hid,), jnp.float32),
    }
    x = jax.random.normal(keys[4], (B, L, hid), jnp.float32)

    y = positionwise_feedforward(x, params)
    jax.block_until_ready(y)

    y_ref = ref_forward(x, params)
    np.testing.assert_allclose(np.asarray(y), np.asarray(y_ref), rtol=1e-5, atol=1e-5)

    print("KERNEL_OK")
</pallas_src>

<mosaic_0001>
module attributes {stable_mosaic.version = 11 : i64} {
  func.func @_ffn_kernel(%arg0: i32, %arg1: memref<16x32xf32, #tpu.memory_space<vmem>>, %arg2: memref<64x32xf32, #tpu.memory_space<vmem>>, %arg3: memref<1x64xf32, #tpu.memory_space<vmem>>, %arg4: memref<32x64xf32, #tpu.memory_space<vmem>>, %arg5: memref<1x32xf32, #tpu.memory_space<vmem>>, %arg6: memref<16x32xf32, #tpu.memory_space<vmem>>) attributes {dimension_semantics = [#tpu.dimension_semantics<parallel>], iteration_bounds = array<i64: 1>, scalar_prefetch = 0 : i64, scratch_operands = 0 : i64, tpu.core_type = #tpu.core_type<tc>, window_params = [{transform_indices = @transform_0, window_bounds = array<i64: 16, 32>}, {pipeline_mode = #tpu.pipeline_mode<synchronous>, transform_indices = @transform_1, window_bounds = array<i64: 64, 32>}, {pipeline_mode = #tpu.pipeline_mode<synchronous>, transform_indices = @transform_2, window_bounds = array<i64: 1, 64>}, {pipeline_mode = #tpu.pipeline_mode<synchronous>, transform_indices = @transform_3, window_bounds = array<i64: 32, 64>}, {pipeline_mode = #tpu.pipeline_mode<synchronous>, transform_indices = @transform_4, window_bounds = array<i64: 1, 32>}, {transform_indices = @transform_5, window_bounds = array<i64: 16, 32>}]} {
    %c0 = arith.constant 0 : index
    %c0_0 = arith.constant 0 : index
    %0 = vector.load %arg1[%c0, %c0_0] : memref<16x32xf32, #tpu.memory_space<vmem>>, vector<16x32xf32>
    %c0_1 = arith.constant 0 : index
    %c0_2 = arith.constant 0 : index
    %1 = vector.load %arg2[%c0_1, %c0_2] : memref<64x32xf32, #tpu.memory_space<vmem>>, vector<64x32xf32>
    %cst = arith.constant dense<0.000000e+00> : vector<16x64xf32>
    %2 = tpu.matmul %0, %1, %cst {dimension_numbers = #tpu.dot_dimension_numbers<[1], [1], [0], [0], [0, 0, 1, 0], [], []>} : vector<16x32xf32>, vector<64x32xf32>, vector<16x64xf32> -> vector<16x64xf32>
    %c0_3 = arith.constant 0 : index
    %c0_4 = arith.constant 0 : index
    %3 = vector.load %arg3[%c0_3, %c0_4] : memref<1x64xf32, #tpu.memory_space<vmem>>, vector<1x64xf32>
    %4 = vector.broadcast %3 : vector<1x64xf32> to vector<16x64xf32>
    %5 = arith.addf %2, %4 : vector<16x64xf32>
    %cst_5 = arith.constant 0.000000e+00 : f32
    %6 = vector.broadcast %cst_5 : f32 to vector<16x64xf32>
    %7 = arith.maximumf %5, %6 : vector<16x64xf32>
    %c0_6 = arith.constant 0 : index
    %c0_7 = arith.constant 0 : index
    %8 = vector.load %arg4[%c0_6, %c0_7] : memref<32x64xf32, #tpu.memory_space<vmem>>, vector<32x64xf32>
    %cst_8 = arith.constant dense<0.000000e+00> : vector<16x32xf32>
    %9 = tpu.matmul %7, %8, %cst_8 {dimension_numbers = #tpu.dot_dimension_numbers<[1], [1], [0], [0], [0, 0, 1, 0], [], []>} : vector<16x64xf32>, vector<32x64xf32>, vector<16x32xf32> -> vector<16x32xf32>
    %c0_9 = arith.constant 0 : index
    %c0_10 = arith.constant 0 : index
    %10 = vector.load %arg5[%c0_9, %c0_10] : memref<1x32xf32, #tpu.memory_space<vmem>>, vector<1x32xf32>
    %11 = vector.broadcast %10 : vector<1x32xf32> to vector<16x32xf32>
    %12 = arith.addf %9, %11 : vector<16x32xf32>
    %c0_11 = arith.constant 0 : index
    %c0_12 = arith.constant 0 : index
    %13 = vector.load %arg6[%c0_11, %c0_12] : memref<16x32xf32, #tpu.memory_space<vmem>>, vector<16x32xf32>
    tpu.vector_store %arg6[%c0_11, %c0_12], %12 {strides = array<i32>} : memref<16x32xf32, #tpu.memory_space<vmem>>, vector<16x32xf32>,
    return
  }
  func.func @transform_0(%arg0: i32) -> (i32, i32) {
    %c0_i32 = arith.constant 0 : i32
    %c0_i32_0 = arith.constant 0 : i32
    return %arg0, %c0_i32 : i32, i32
  }
  func.func @transform_1(%arg0: i32) -> (i32, i32) {
    %c0_i32 = arith.constant 0 : i32
    %c0_i32_0 = arith.constant 0 : i32
    %c0_i32_1 = arith.constant 0 : i32
    return %c0_i32, %c0_i32_0 : i32, i32
  }
  func.func @transform_2(%arg0: i32) -> (i32, i32) {
    %c0_i32 = arith.constant 0 : i32
    %c0_i32_0 = arith.constant 0 : i32
    %c0_i32_1 = arith.constant 0 : i32
    return %c0_i32, %c0_i32_0 : i32, i32
  }
  func.func @transform_3(%arg0: i32) -> (i32, i32) {
    %c0_i32 = arith.constant 0 : i32
    %c0_i32_0 = arith.constant 0 : i32
    %c0_i32_1 = arith.constant 0 : i32
    return %c0_i32, %c0_i32_0 : i32, i32
  }
  func.func @transform_4(%arg0: i32) -> (i32, i32) {
    %c0_i32 = arith.constant 0 : i32
    %c0_i32_0 = arith.constant 0 : i32
    %c0_i32_1 = arith.constant 0 : i32
    return %c0_i32, %c0_i32_0 : i32, i32
  }
  func.func @transform_5(%arg0: i32) -> (i32, i32) {
    %c0_i32 = arith.constant 0 : i32
    %c0_i32_0 = arith.constant 0 : i32
    return %arg0, %c0_i32 : i32, i32
  }
}

</mosaic_0001>

<bundles_post_ra>
// kernel: tpu_custom_call.1
= control target key start
LH: loop header
LB: loop body
LE: loop exit
PB: predicated region body
PF: predicated region fallthrough
CT: control target
= control target key end

     0   :  { %vm38_vm0 = vcmask 261120   ;;  %vm157_vm2 = vcmask 523264   ;;  %s531_s0 = inlined_call_operand.vmem [shape: f32[16,32], index: 0, kind: input, shape index: {}]   ;;  %s532_s1 = inlined_call_operand.vmem [shape: f32[64,32], index: 1, kind: input, shape index: {}]   ;;  %s533_s2 = inlined_call_operand.vmem [shape: f32[1,64], index: 2, kind: input, shape index: {}]   ;;  %s534_s3 = inlined_call_operand.vmem [shape: f32[32,64], index: 3, kind: input, shape index: {}]   ;;  %s535_s4 = inlined_call_operand.vmem [shape: f32[1,32], index: 4, kind: input, shape index: {}]   ;;  %s536_s5 = inlined_call_operand.hbm [shape: f32[16,32], index: 5, kind: output, shape index: {}]  }
   0x1   :  { %v23_v0 = vld [vmem:[%s532_s1] sm:$0xff]  ;;  %v24_v1 = vld [vmem:[%s532_s1 + $0x8] sm:$0xff]  ;;  %v25_v2 = vld [vmem:[%s532_s1 + $0x10] sm:$0xff] }
   0x2   :  { %v333_v3 = vpack.c.bf16 %v24_v1, %v23_v0  ;;  %vm440_vm1 = vmpackc.low %vm38_vm0, %vm38_vm0  ;;  %v26_v5 = vld [vmem:[%s532_s1 + $0x18] sm:$0xff]  ;;  %v21_v7 = vld [vmem:[%s531_s0] sm:$0xff] }
   0x3   :  { %v339_v6 = vpack.c.bf16 %v26_v5, %v25_v2  ;;  %v146_v8 = vld [vmem:[%s534_s3] sm:$0xff]  ;;  %319 = vmatprep.mubr.msk.f32.mxu0 %vm38_vm0, %v21_v7  ;;  %v147_v9 = vld [vmem:[%s534_s3 + $0x8] sm:$0xff]  ;;  %vm463_vm3 = vmpackc.low %vm157_vm2, %vm157_vm2 }
   0x4   :  { %335 = vmatprep.subr.msk.bf16.mxu0 %vm440_vm1, %v333_v3  ;;  %v148_v11 = vld [vmem:[%s534_s3 + $0x10] sm:$0xff]  ;;  %v357_v12 = vpack.c.bf16 %v147_v9, %v146_v8  ;;  %v149_v13 = vld [vmem:[%s534_s3 + $0x18] sm:$0xff] }
   0x5   :  { %338 = vmatpush3.bf16.xpose.msk.msra.mxu0 %vm440_vm1, %v333_v3 }
   0x6   :  { %341 = vmatprep.subr.msk.bf16.mxu0 %vm440_vm1, %v339_v6 }
   0x7   :  { %10 = vsyncpa [#allocation3], 0  ;;  %v27_v14 = vld [vmem:[%s532_s1 + $0x20] sm:$0xff]  ;;  %v28_v15 = vld [vmem:[%s532_s1 + $0x28] sm:$0xff]  ;;  %v363_v16 = vpack.c.bf16 %v149_v13, %v148_v11  ;;  %359 = vmatprep.subr.msk.bf16.mxu1 %vm463_vm3, %v357_v12 }
   0x8   :  { %362 = vmatpush3.bf16.xpose.msk.msra.mxu1 %vm463_vm3, %v357_v12  ;;  %v345_v17 = vpack.c.bf16 %v28_v15, %v27_v14  ;;  %v29_v18 = vld [vmem:[%s532_s1 + $0x30] sm:$0xff]  ;;  %v30_v19 = vld [vmem:[%s532_s1 + $0x38] sm:$0xff]  ;;  %v22_v21 = vld [vmem:[%s531_s0 + $0x8] sm:$0xff]  ;;  %s396_s0 = smov [#allocation2]  }
   0x9   :  { %365 = vmatprep.subr.msk.bf16.mxu1 %vm463_vm3, %v363_v16  ;;  %v351_v20 = vpack.c.bf16 %v30_v19, %v29_v18  ;;  %v269_v22 = vld [vmem:[%s533_s2] ss:$0 sm:$0xff]  ;;  %s258_s23 = sshll.u32 %s396_s0, 4  ;;  %s259_s23 = int_to_ptr.vmem [resolvable:$true] %s258_s23 }
   0xa   :  { %v280_v29 = vld [vmem:[%s535_s4] ss:$0 sm:$0xff]  ;;  %s372_s2 = scalar_lea.vmem %s259_s23, 256  ;;  %p377_p1 = scmp.lt.s32.totalorder %s259_s23, %s259_s23 }
   0xb   :  { %p373_p0 = scmp.ne.s32.totalorder %s259_s23, %s372_s2  ;;  %p378_p2 = scmp.lt.s32.totalorder %s372_s2, %s372_s2 }
   0xd   :  { %344 = vmatpush3.bf16.xpose.msk.msra.mxu0 %vm440_vm1, %v339_v6  ;;  %p379_p3 = por %p378_p2, %p377_p1 }
   0xe   :  { %347 = vmatprep.subr.msk.bf16.mxu0 %vm440_vm1, %v345_v17 }
   0xf   :  { %p380_p4 = pnand %p379_p3, %p373_p0 }
  0x10   :  { %368 = vmatpush3.bf16.xpose.msk.msra.mxu1 %vm463_vm3, %v363_v16 }
  0x15   :  { %350 = vmatpush3.bf16.xpose.msk.msra.mxu0 %vm440_vm1, %v345_v17 }
  0x16   :  { %353 = vmatprep.subr.msk.bf16.mxu0 %vm440_vm1, %v351_v20 }
  0x1d   :  { %356 = vmatpush3.bf16.xpose.msk.msra.mxu0 %vm440_vm1, %v351_v20 }
  0x24   :  { %320 = vmatmul.mubr.msk.f32.vlgmr.msra.gmra.mrb[0].mxu0 %vm38_vm0, %v22_v21 }
  0xf7   :  { %v321_v23 = vpop.f32.mrb[0].mxu0 }
  0xf8   :  { %v141_v24 = vadd.f32 %v321_v23, %v269_v22  ;;  %v135_v25 = vpop.f32.mrb[1].mxu0 }
  0xf9   :  { %v136_v26 = vadd.f32 %v269_v22, %v135_v25 }
  0xfa   :  { %v145_v28 = vmax.f32 %v141_v24, 0.0 }
  0xfb   :  { %v144_v27 = vmax.f32 %v136_v26, 0.0 }
  0xfd   :  { %330 = vmatprep.mubr.msk.f32.mxu1 %vm157_vm2, %v144_v27 }
  0xfe   :  { %331 = vmatmul.mubr.msk.f32.vlgmr.msra.gmra.mrb[0].mxu1 %vm157_vm2, %v145_v28 }
 0x1d1   :  { %v332_v30 = vpop.f32.mrb[0].mxu1 }
 0x1d2   :  { %v248_v31 = vadd.f32 %v332_v30, %v280_v29  ;;  %v242_v32 = vpop.f32.mrb[1].mxu1 }
 0x1d3   :  { %v243_v33 = vadd.f32 %v280_v29, %v242_v32 }
 0x1d4   :  { %252 = vst.msk [vmem:[#allocation2 + $0x8] sm:$0xff] %vm38_vm0, %v248_v31 }
 0x1d5   :  { %251 = vst.msk [vmem:[#allocation2] sm:$0xff] %vm38_vm0, %v243_v33 }
 0x1d6   :  { %383 = shalt.err (!%p380_p4)
}
 0x1d7   :  { %s384_s25 = scalar_lea.hbm %s536_s5, 256 }
 0x1d8   :  { %p385_p5 = scmp.ne.s32.totalorder %s536_s5, %s384_s25  ;;  %p388_p6 = scmp.lt.u32.totalorder %s384_s25, %s536_s5 }
 0x1da   :  { %p390_p7 = pnand %p388_p6, %p385_p5 }
 0x1dc   :  { %393 = shalt.err (!%p390_p7)
}
 0x1dd   :  { %s397_s30 = smov 128   ;;  %s398_s6 = smov 8  }
 0x1de   :  { %264 = dma.vmem_to_hbm [thread:$0]  %s259_s23, 256, %s536_s5, [#allocation3], %s397_s30, %s397_s30, %s398_s6  }
 0x1df   :  { %394 = dma.done.wait [#allocation3], 256  }
 0x1e0   :  { %395 = vsyncadd [#allocation3], 4294967040 }
 0x1e1   :  { %268 = vsyncpa [#allocation3], 1 }

</bundles_post_ra>
